<compile_context>
chip_gen: v7x
topology: tpu7x:2x2x1
jax: 0.10.0
libtpu: 0.0.40
codegen_flags: <defaults>
</compile_context>

<pallas_src>
import jax
import jax.numpy as jnp
from jax import lax
from jax.experimental import pallas as pl
from jax.experimental.pallas import tpu as pltpu

GROUP_SIZE = 4   # |P4| = 4 planar rotations
KH = KW = 3      # filter_size = (3, 3)


# ----------------------------------------------------------------------------
# Kernel: one lane-dense MXU matmul per grid step.
# ----------------------------------------------------------------------------
def _basis_race_kernel(x_ref, m_ref, o_ref):
    """x_ref: (TB, Cin*H*W) native dtype; m_ref: (Cin*H*W, Cout*4) f32;
    o_ref: (TB, Cout*4) f32."""
    x = x_ref[...].astype(jnp.float32)            # upcast in-kernel (bf16-friendly DMA)
    o_ref[...] = jnp.dot(x, m_ref[...],
                         preferred_element_type=jnp.float32).astype(o_ref.dtype)


# ----------------------------------------------------------------------------
# Equivariant weight + folded conv/GAP matrix (plain JAX, wrapper-time).
# ----------------------------------------------------------------------------
def make_equivariant_weight(w_base):
    """Lift a base filter (Cout, Cin, KH, KW) to the P4-equivariant conv weight
    (Cout*4, Cin, KH, KW) in OIHW, channel index = c_out * 4 + r."""
    cout, cin, kh, kw = w_base.shape
    rots = [jnp.rot90(w_base, k=r, axes=(-2, -1)) for r in range(GROUP_SIZE)]
    w_full = jnp.stack(rots, axis=1)                      # (Cout, 4, Cin, KH, KW)
    return w_full.reshape(cout * GROUP_SIZE, cin, kh, kw)


def make_folded_matrix(w_full, h, w):
    """Fold 'VALID 3x3 conv then global average pool' into one linear map.

    Returns M of shape (Cin*H*W, Cout*4) with row index (c*H + y)*W + x, so
    that  pooled = x.reshape(N, Cin*H*W) @ M  exactly equals
    mean_{spatial}(conv2d(x, w_full, VALID))."""
    cout_total, cin, kh, kw = w_full.shape
    ho, wo = h - kh + 1, w - kw + 1
    inv_area = 1.0 / float(ho * wo)
    # cov_y[i, y] == 1 iff tap row i of some valid output window hits image row y.
    ys = jnp.arange(h)[None, :]
    iy = jnp.arange(kh)[:, None]
    cov_y = ((ys - iy >= 0) & (ys - iy < ho)).astype(jnp.float32)   # (KH, H)
    xs = jnp.arange(w)[None, :]
    jx = jnp.arange(kw)[:, None]
    cov_x = ((xs - jx >= 0) & (xs - jx < wo)).astype(jnp.float32)   # (KW, W)
    m = jnp.einsum('iy,jx,ocij->cyxo', cov_y, cov_x,
                   w_full.astype(jnp.float32))                      # (Cin,H,W,Cout*4)
    return (m * inv_area).reshape(cin * h * w, cout_total)


# ----------------------------------------------------------------------------
# Tiling / VMEM budgeting.
# ----------------------------------------------------------------------------
def _vmem_capacity_bytes():
    """Physical per-core VMEM; conservative 64 MiB (v7x per-TC) fallback."""
    try:
        return int(pltpu.get_tpu_info().vmem_capacity_bytes)
    except Exception:
        return 64 * 1024 * 1024


def _num_tensorcores_per_chip():
    """Best-effort guess of TensorCores one Pallas program can shard over."""
    try:
        kind = jax.devices()[0].device_kind.lower()
    except Exception:
        return 1
    if "v7" in kind:
        return 2
    # Megacore chips (v4 / v5p) expose 2 TCs; the *e / lite chips have 1.
    if ("v4" in kind or "v5p" in kind) and "lite" not in kind:
        return 2
    return 1


def _sublane_quantum(itemsize):
    # f32 -> 8, bf16 -> 16, int8/fp8 -> 32 rows per tile.
    return max(8, 32 // int(itemsize))


def _pick_block_batch(n, k_dim, itemsize):
    """Largest batch tile whose double-buffered activation footprint fits
    ~1/3 of physical VMEM, while keeping >= num_cores grid steps on megacore
    chips so the single 'parallel' axis shards across TensorCores."""
    sub = _sublane_quantum(itemsize)
    k_pad = pl.cdiv(k_dim, 128) * 128
    per_row = k_pad * itemsize
    act_budget = _vmem_capacity_bytes() // 3
    tb = max(1, act_budget // (2 * per_row))          # x2: double-buffered input
    cores = _num_tensorcores_per_chip()
    if cores > 1 and n > cores:
        tb = min(tb, pl.cdiv(n, cores))
    tb = min(tb, n)
    if tb < n:
        tb = max(sub, (tb // sub) * sub)              # keep (8,128)-legal leading dim
        tb = min(tb, n)
    return int(tb)


def _vmem_limit_bytes(tb, k_dim, cout_total, itemsize):
    sub = _sublane_quantum(itemsize)
    k_pad = pl.cdiv(k_dim, 128) * 128
    tb_pad_in = pl.cdiv(tb, sub) * sub
    tb_pad_out = pl.cdiv(tb, 8) * 8
    co_pad = pl.cdiv(cout_total, 128) * 128
    act = 2 * tb_pad_in * k_pad * itemsize            # double-buffered input block
    out = 2 * tb_pad_out * co_pad * 4                 # double-buffered f32 output block
    wgt = 2 * k_pad * co_pad * 4                      # weight (conservatively x2)
    slack = 2 * 1024 * 1024
    return int(min(_vmem_capacity_bytes(), act + out + wgt + slack))


# ----------------------------------------------------------------------------
# Public wrapper.
# ----------------------------------------------------------------------------
def basis_race_layer(state_nchw, w_base, *, block_batch=None):
    """Pallas forward of BasisRaceLayer. Returns (N, C_out, 4) float32."""
    n, cin, h, w = state_nchw.shape
    cout = w_base.shape[0]
    cout_total = cout * GROUP_SIZE
    k_dim = cin * h * w
    itemsize = jnp.dtype(state_nchw.dtype).itemsize

    # Fold P4-equivariant conv + global average pool into one matrix.
    w_full = make_equivariant_weight(w_base)
    m = make_folded_matrix(w_full, h, w)               # (Cin*H*W, Cout*4) f32

    # Free view of contiguous NCHW memory; native dtype streamed to the kernel.
    x = state_nchw.reshape(n, k_dim)

    tb = block_batch if block_batch is not None else _pick_block_batch(n, k_dim, itemsize)
    tb = max(1, min(int(tb), n))
    grid = (pl.cdiv(n, tb),)

    cost = pl.CostEstimate(
        flops=2 * n * k_dim * cout_total,
        transcendentals=0,
        bytes_accessed=n * k_dim * itemsize + k_dim * cout_total * 4
                       + n * cout_total * 4)

    pooled = pl.pallas_call(
        _basis_race_kernel,
        out_shape=jax.ShapeDtypeStruct((n, cout_total), jnp.float32),
        grid_spec=pltpu.PrefetchScalarGridSpec(
            num_scalar_prefetch=0,
            grid=grid,
            in_specs=[
                # Lane-dense activation block (last dim = Cin*H*W, contiguous DMA).
                pl.BlockSpec((tb, k_dim), lambda b: (b, 0)),
                # Constant block index -> weight fetched once, stays resident.
                pl.BlockSpec((k_dim, cout_total), lambda b: (0, 0)),
            ],
            out_specs=pl.BlockSpec((tb, cout_total), lambda b: (b, 0)),
        ),
        compiler_params=pltpu.CompilerParams(
            dimension_semantics=("parallel",),
            vmem_limit_bytes=_vmem_limit_bytes(tb, k_dim, cout_total, itemsize)),
        cost_estimate=cost,
    )(x, m)

    # c2g(., 4): channel axis (Cout*4) -> (Cout, group)
    return pooled.reshape(n, cout, GROUP_SIZE)


# ----------------------------------------------------------------------------
# Plain-JAX reference (conv2d -> global average pool -> c2g).
# ----------------------------------------------------------------------------
def basis_race_layer_reference(state_nchw, w_base):
    w_full = make_equivariant_weight(w_base)
    y = lax.conv_general_dilated(
        state_nchw.astype(jnp.float32), w_full.astype(jnp.float32),
        window_strides=(1, 1), padding="VALID",
        dimension_numbers=("NCHW", "OIHW", "NCHW"))
    pooled = jnp.mean(y, axis=(2, 3))                  # (N, Cout*4)
    return pooled.reshape(pooled.shape[0], -1, GROUP_SIZE)


if __name__ == "__main__":
    # Small shapes consistent with the module: batch=2, C_in=4, 16x16 images,
    # output_size=8 (conv produces 8*4=32 channels before c2g).
    N, C_IN, H, W = 2, 4, 16, 16
    C_OUT = 8

    key = jax.random.PRNGKey(0)
    k_x, k_w = jax.random.split(key)
    state = jax.random.normal(k_x, (N, C_IN, H, W), dtype=jnp.float32)
    # Deterministic 'he'-style init of the base filter (fan_in = C_in * 3 * 3).
    he_std = (2.0 / (C_IN * KH * KW)) ** 0.5
    w_base = he_std * jax.random.normal(k_w, (C_OUT, C_IN, KH, KW),
                                        dtype=jnp.float32)

    out = basis_race_layer(state, w_base)
    out = jax.block_until_ready(out)
    assert out.shape == (N, C_OUT, GROUP_SIZE), out.shape

    ref = jax.block_until_ready(basis_race_layer_reference(state, w_base))
    if not jnp.allclose(out, ref, atol=1e-4, rtol=1e-4):
        raise AssertionError("Pallas kernel does not match JAX reference")

    print("KERNEL_OK")
</pallas_src>

<mosaic_0001>
module attributes {stable_mosaic.version = 11 : i64} {
  func.func @_basis_race_kernel(%arg0: i32, %arg1: memref<2x1024xf32, #tpu.memory_space<vmem>>, %arg2: memref<1024x32xf32, #tpu.memory_space<vmem>>, %arg3: memref<2x32xf32, #tpu.memory_space<vmem>>) attributes {dimension_semantics = [#tpu.dimension_semantics<parallel>], iteration_bounds = array<i64: 1>, scalar_prefetch = 0 : i64, scratch_operands = 0 : i64, tpu.core_type = #tpu.core_type<tc>, window_params = [{transform_indices = @transform_0, window_bounds = array<i64: 2, 1024>}, {pipeline_mode = #tpu.pipeline_mode<synchronous>, transform_indices = @transform_1, window_bounds = array<i64: 1024, 32>}, {transform_indices = @transform_2, window_bounds = array<i64: 2, 32>}]} {
    %c0 = arith.constant 0 : index
    %c0_0 = arith.constant 0 : index
    %0 = vector.load %arg1[%c0, %c0_0] : memref<2x1024xf32, #tpu.memory_space<vmem>>, vector<2x1024xf32>
    %c0_1 = arith.constant 0 : index
    %c0_2 = arith.constant 0 : index
    %1 = vector.load %arg2[%c0_1, %c0_2] : memref<1024x32xf32, #tpu.memory_space<vmem>>, vector<1024x32xf32>
    %cst = arith.constant dense<0.000000e+00> : vector<2x32xf32>
    %2 = tpu.matmul %0, %1, %cst {dimension_numbers = #tpu.dot_dimension_numbers<[1], [0], [0], [1], [0, 0, 1, 1], [], []>} : vector<2x1024xf32>, vector<1024x32xf32>, vector<2x32xf32> -> vector<2x32xf32>
    %c0_3 = arith.constant 0 : index
    %c0_4 = arith.constant 0 : index
    %3 = vector.load %arg3[%c0_3, %c0_4] : memref<2x32xf32, #tpu.memory_space<vmem>>, vector<2x32xf32>
    tpu.vector_store %arg3[%c0_3, %c0_4], %2 {strides = array<i32>} : memref<2x32xf32, #tpu.memory_space<vmem>>, vector<2x32xf32>,
    return
  }
  func.func @transform_0(%arg0: i32) -> (i32, i32) {
    %c0_i32 = arith.constant 0 : i32
    %c0_i32_0 = arith.constant 0 : i32
    return %arg0, %c0_i32 : i32, i32
  }
  func.func @transform_1(%arg0: i32) -> (i32, i32) {
    %c0_i32 = arith.constant 0 : i32
    %c0_i32_0 = arith.constant 0 : i32
    %c0_i32_1 = arith.constant 0 : i32
    return %c0_i32, %c0_i32_0 : i32, i32
  }
  func.func @transform_2(%arg0: i32) -> (i32, i32) {
    %c0_i32 = arith.constant 0 : i32
    %c0_i32_0 = arith.constant 0 : i32
    return %arg0, %c0_i32 : i32, i32
  }
}

</mosaic_0001>

<bundles_post_ra>
// kernel: tpu_custom_call.1
= control target key start
LH: loop header
LB: loop body
LE: loop exit
PB: predicated region body
PF: predicated region fallthrough
CT: control target
= control target key end

     0   :  { %v778_v47 = vmov 1983009808   ;;  %v148_v49 = vlaneseq  ;;  %s1208_s0 = inlined_call_operand.vmem [shape: f32[2,1024], index: 0, kind: input, shape index: {}]   ;;  %s1209_s1 = inlined_call_operand.vmem [shape: f32[1024,32], index: 1, kind: input, shape index: {}]   ;;  %s1210_s2 = inlined_call_operand.hbm [shape: f32[2,32], index: 2, kind: output, shape index: {}]  }
   0x1   :  { %v30_v0 = vld [vmem:[%s1209_s1 + $0x80] sm:$0xff]  ;;  %v31_v1 = vld [vmem:[%s1209_s1 + $0x88] sm:$0xff]  ;;  %v32_v11 = vld [vmem:[%s1209_s1 + $0x90] sm:$0xff]  ;;  %v146_v48 = vunpack.c.l.s4 %v778_v47 }
   0x2   :  { %v62_v2 = vld [vmem:[%s1209_s1 + $0x180] sm:$0xff]  ;;  %v622_v3 = vpack.c.bf16 %v31_v1, %v30_v0  ;;  %v63_v4 = vld [vmem:[%s1209_s1 + $0x188] sm:$0xff]  ;;  %v33_v13 = vld [vmem:[%s1209_s1 + $0x98] sm:$0xff]  ;;  %v149_v0 = vshrl.u32 %v148_v49, 7 }
   0x3   :  { %v14_v5 = vld [vmem:[%s1209_s1] sm:$0xff]  ;;  %v15_v6 = vld [vmem:[%s1209_s1 + $0x8] sm:$0xff]  ;;  %v654_v7 = vpack.c.bf16 %v63_v4, %v62_v2  ;;  %v64_v14 = vld [vmem:[%s1209_s1 + $0x190] sm:$0xff]  ;;  %v626_v16 = vpack.c.bf16 %v33_v13, %v32_v11  ;;  %v147_v63 = vunpack.c.0.s8 %v146_v48 }
   0x4   :  { %v624_v8 = vpack.c.bf16 %v15_v6, %v14_v5  ;;  %v46_v9 = vld [vmem:[%s1209_s1 + $0x100] sm:$0xff]  ;;  %v47_v10 = vld [vmem:[%s1209_s1 + $0x108] sm:$0xff]  ;;  %623 = vmatprep.subr.bf16.mxu0 %v622_v3  ;;  %v65_v15 = vld [vmem:[%s1209_s1 + $0x198] sm:$0xff] }
   0x5   :  { %v656_v12 = vpack.c.bf16 %v47_v10, %v46_v9  ;;  %655 = vmatprep.subr.bf16.mxu1 %v654_v7  ;;  %v658_v17 = vpack.c.bf16 %v65_v15, %v64_v14  ;;  %v16_v18 = vld [vmem:[%s1209_s1 + $0x10] sm:$0xff]  ;;  %v17_v19 = vld [vmem:[%s1209_s1 + $0x18] sm:$0xff]  ;;  %v34_v23 = vld [vmem:[%s1209_s1 + $0xa0] sm:$0xff]  ;;  %v945_v13 = vsub.s32 %v147_v63, %v149_v0 }
   0x6   :  { %625 = vmatpush3.bf16.msra.mxu0 %v624_v8  ;;  %v48_v20 = vld [vmem:[%s1209_s1 + $0x110] sm:$0xff]  ;;  %v628_v21 = vpack.c.bf16 %v17_v19, %v16_v18  ;;  %v49_v22 = vld [vmem:[%s1209_s1 + $0x118] sm:$0xff]  ;;  %v35_v24 = vld [vmem:[%s1209_s1 + $0xa8] sm:$0xff] }
   0x7   :  { %657 = vmatpush3.bf16.msra.mxu1 %v656_v12  ;;  %627 = vmatprep.subr.bf16.mxu0 %v626_v16  ;;  %v660_v25 = vpack.c.bf16 %v49_v22, %v48_v20  ;;  %v630_v26 = vpack.c.bf16 %v35_v24, %v34_v23  ;;  %v66_v27 = vld [vmem:[%s1209_s1 + $0x1a0] sm:$0xff]  ;;  %v67_v28 = vld [vmem:[%s1209_s1 + $0x1a8] sm:$0xff]  ;;  %v36_v35 = vld [vmem:[%s1209_s1 + $0xb0] sm:$0xff] }
   0x8   :  { %659 = vmatprep.subr.bf16.mxu1 %v658_v17  ;;  %v18_v29 = vld [vmem:[%s1209_s1 + $0x20] sm:$0xff]  ;;  %v662_v30 = vpack.c.bf16 %v67_v28, %v66_v27  ;;  %v19_v31 = vld [vmem:[%s1209_s1 + $0x28] sm:$0xff]  ;;  %v37_v36 = vld [vmem:[%s1209_s1 + $0xb8] sm:$0xff] }
   0x9   :  { %v50_v32 = vld [vmem:[%s1209_s1 + $0x120] sm:$0xff]  ;;  %v51_v33 = vld [vmem:[%s1209_s1 + $0x128] sm:$0xff]  ;;  %v632_v34 = vpack.c.bf16 %v19_v31, %v18_v29  ;;  %v68_v37 = vld [vmem:[%s1209_s1 + $0x1b0] sm:$0xff]  ;;  %v634_v39 = vpack.c.bf16 %v37_v36, %v36_v35 }
   0xa   :  { %629 = vmatpush3.bf16.msra.mxu0 %v628_v21  ;;  %v664_v38 = vpack.c.bf16 %v51_v33, %v50_v32  ;;  %v69_v40 = vld [vmem:[%s1209_s1 + $0x1b8] sm:$0xff]  ;;  %v20_v41 = vld [vmem:[%s1209_s1 + $0x30] sm:$0xff]  ;;  %v38_v46 = vld [vmem:[%s1209_s1 + $0xc0] sm:$0xff] }
   0xb   :  { %661 = vmatpush3.bf16.msra.mxu1 %v660_v25  ;;  %631 = vmatprep.subr.bf16.mxu0 %v630_v26  ;;  %v21_v42 = vld [vmem:[%s1209_s1 + $0x38] sm:$0xff]  ;;  %v666_v43 = vpack.c.bf16 %v69_v40, %v68_v37  ;;  %v52_v44 = vld [vmem:[%s1209_s1 + $0x130] sm:$0xff]  ;;  %v39_v50 = vld [vmem:[%s1209_s1 + $0xc8] sm:$0xff] }
   0xc   :  { %663 = vmatprep.subr.bf16.mxu1 %v662_v30  ;;  %v53_v45 = vld [vmem:[%s1209_s1 + $0x138] sm:$0xff]  ;;  %v70_v51 = vld [vmem:[%s1209_s1 + $0x1c0] sm:$0xff]  ;;  %v71_v52 = vld [vmem:[%s1209_s1 + $0x1c8] sm:$0xff]  ;;  %v636_v53 = vpack.c.bf16 %v21_v42, %v20_v41  ;;  %v638_v55 = vpack.c.bf16 %v39_v50, %v38_v46 }
   0xd   :  { %v668_v54 = vpack.c.bf16 %v53_v45, %v52_v44  ;;  %v22_v56 = vld [vmem:[%s1209_s1 + $0x40] sm:$0xff]  ;;  %v23_v57 = vld [vmem:[%s1209_s1 + $0x48] sm:$0xff]  ;;  %v670_v59 = vpack.c.bf16 %v71_v52, %v70_v51  ;;  %v40_v61 = vld [vmem:[%s1209_s1 + $0xd0] sm:$0xff] }
   0xe   :  { %633 = vmatpush3.bf16.msra.mxu0 %v632_v34  ;;  %v54_v58 = vld [vmem:[%s1209_s1 + $0x140] sm:$0xff]  ;;  %v55_v60 = vld [vmem:[%s1209_s1 + $0x148] sm:$0xff]  ;;  %v41_v62 = vld [vmem:[%s1209_s1 + $0xd8] sm:$0xff]  ;;  %v640_v3 = vpack.c.bf16 %v23_v57, %v22_v56 }
   0xf   :  { %665 = vmatpush3.bf16.msra.mxu1 %v664_v38  ;;  %635 = vmatprep.subr.bf16.mxu0 %v634_v39  ;;  %v72_v1 = vld [vmem:[%s1209_s1 + $0x1d0] sm:$0xff]  ;;  %v73_v2 = vld [vmem:[%s1209_s1 + $0x1d8] sm:$0xff]  ;;  %v672_v4 = vpack.c.bf16 %v55_v60, %v54_v58  ;;  %v642_v5 = vpack.c.bf16 %v41_v62, %v40_v61  ;;  %v42_v11 = vld [vmem:[%s1209_s1 + $0xe0] sm:$0xff] }
  0x10   :  { %667 = vmatprep.subr.bf16.mxu1 %v666_v43  ;;  %v24_v6 = vld [vmem:[%s1209_s1 + $0x50] sm:$0xff]  ;;  %v25_v7 = vld [vmem:[%s1209_s1 + $0x58] sm:$0xff]  ;;  %v674_v9 = vpack.c.bf16 %v73_v2, %v72_v1  ;;  %v43_v12 = vld [vmem:[%s1209_s1 + $0xe8] sm:$0xff] }
  0x11   :  { %v56_v8 = vld [vmem:[%s1209_s1 + $0x150] sm:$0xff]  ;;  %v57_v10 = vld [vmem:[%s1209_s1 + $0x158] sm:$0xff]  ;;  %v74_v14 = vld [vmem:[%s1209_s1 + $0x1e0] sm:$0xff]  ;;  %v644_v16 = vpack.c.bf16 %v25_v7, %v24_v6  ;;  %v646_v19 = vpack.c.bf16 %v43_v12, %v42_v11 }
  0x12   :  { %637 = vmatpush3.bf16.msra.mxu0 %v636_v53  ;;  %v75_v15 = vld [vmem:[%s1209_s1 + $0x1e8] sm:$0xff]  ;;  %v26_v17 = vld [vmem:[%s1209_s1 + $0x60] sm:$0xff]  ;;  %v676_v18 = vpack.c.bf16 %v57_v10, %v56_v8  ;;  %v44_v25 = vld [vmem:[%s1209_s1 + $0xf0] sm:$0xff] }
  0x13   :  { %669 = vmatpush3.bf16.msra.mxu1 %v668_v54  ;;  %639 = vmatprep.subr.bf16.mxu0 %v638_v55  ;;  %v27_v20 = vld [vmem:[%s1209_s1 + $0x68] sm:$0xff]  ;;  %v58_v21 = vld [vmem:[%s1209_s1 + $0x160] sm:$0xff]  ;;  %v678_v23 = vpack.c.bf16 %v75_v15, %v74_v14  ;;  %v45_v26 = vld [vmem:[%s1209_s1 + $0xf8] sm:$0xff] }
  0x14   :  { %671 = vmatprep.subr.bf16.mxu1 %v670_v59  ;;  %v12_v22 = vld [vmem:[%s1208_s0] sm:$0xff]  ;;  %v59_v24 = vld [vmem:[%s1209_s1 + $0x168] sm:$0xff]  ;;  %v76_v29 = vld [vmem:[%s1209_s1 + $0x1f0] sm:$0xff]  ;;  %v648_v31 = vpack.c.bf16 %v27_v20, %v26_v17  ;;  %v650_v35 = vpack.c.bf16 %v45_v26, %v44_v25 }
  0x15   :  { %v151_v27 = vrot.slane %v12_v22, %v945_v13  ;;  %v144_v28 = vcombine.high %v12_v22, %v12_v22  ;;  %v77_v30 = vld [vmem:[%s1209_s1 + $0x1f8] sm:$0xff]  ;;  %v680_v34 = vpack.c.bf16 %v59_v24, %v58_v21  ;;  %v28_v36 = vld [vmem:[%s1209_s1 + $0x70] sm:$0xff]  ;;  %v94_v42 = vld [vmem:[%s1209_s1 + $0x280] sm:$0xff] }
  0x16   :  { %641 = vmatpush3.bf16.msra.mxu0 %v640_v3  ;;  %v29_v37 = vld [vmem:[%s1209_s1 + $0x78] sm:$0xff]  ;;  %v60_v38 = vld [vmem:[%s1209_s1 + $0x170] sm:$0xff]  ;;  %v682_v39 = vpack.c.bf16 %v77_v30, %v76_v29  ;;  %v95_v43 = vld [vmem:[%s1209_s1 + $0x288] sm:$0xff] }
  0x17   :  { %673 = vmatpush3.bf16.msra.mxu1 %v672_v4  ;;  %643 = vmatprep.subr.bf16.mxu0 %v642_v5  ;;  %v159_v32 = vcombine.high %v151_v27, %v151_v27  ;;  %v158_v33 = vrot.slane %v144_v28, %v945_v13  ;;  %v61_v40 = vld [vmem:[%s1209_s1 + $0x178] sm:$0xff]  ;;  %v126_v44 = vld [vmem:[%s1209_s1 + $0x380] sm:$0xff]  ;;  %v127_v45 = vld [vmem:[%s1209_s1 + $0x388] sm:$0xff]  ;;  %v652_v46 = vpack.c.bf16 %v29_v37, %v28_v36 }
  0x18   :  { %675 = vmatprep.subr.bf16.mxu1 %v674_v9  ;;  %v684_v47 = vpack.c.bf16 %v61_v40, %v60_v38  ;;  %v686_v48 = vpack.c.bf16 %v95_v43, %v94_v42  ;;  %v78_v49 = vld [vmem:[%s1209_s1 + $0x200] sm:$0xff]  ;;  %v79_v50 = vld [vmem:[%s1209_s1 + $0x208] sm:$0xff]  ;;  %v718_v52 = vpack.c.bf16 %v127_v45, %v126_v44  ;;  %v96_v54 = vld [vmem:[%s1209_s1 + $0x290] sm:$0xff] }
  0x19   :  { %250 = vmatprep.mubr.f32.mxu0 %v159_v32  ;;  %v160_v41 = vcombine.high %v158_v33, %v158_v33  ;;  %v110_v51 = vld [vmem:[%s1209_s1 + $0x300] sm:$0xff]  ;;  %v111_v53 = vld [vmem:[%s1209_s1 + $0x308] sm:$0xff]  ;;  %v97_v55 = vld [vmem:[%s1209_s1 + $0x298] sm:$0xff]  ;;  %v688_v58 = vpack.c.bf16 %v79_v50, %v78_v49 }
  0x1a   :  { %645 = vmatpush3.bf16.msra.mxu0 %v644_v16  ;;  %v128_v56 = vld [vmem:[%s1209_s1 + $0x390] sm:$0xff]  ;;  %v129_v57 = vld [vmem:[%s1209_s1 + $0x398] sm:$0xff]  ;;  %v720_v59 = vpack.c.bf16 %v111_v53, %v110_v51  ;;  %v690_v60 = vpack.c.bf16 %v97_v55, %v96_v54  ;;  %v98_v2 = vld [vmem:[%s1209_s1 + $0x2a0] sm:$0xff] }
  0x1b   :  { %677 = vmatpush3.bf16.msra.mxu1 %v676_v18  ;;  %647 = vmatprep.subr.bf16.mxu0 %v646_v19  ;;  %v80_v61 = vld [vmem:[%s1209_s1 + $0x210] sm:$0xff]  ;;  %v81_v62 = vld [vmem:[%s1209_s1 + $0x218] sm:$0xff]  ;;  %v722_v0 = vpack.c.bf16 %v129_v57, %v128_v56  ;;  %v99_v3 = vld [vmem:[%s1209_s1 + $0x2a8] sm:$0xff] }
  0x1c   :  { %679 = vmatprep.subr.bf16.mxu1 %v678_v23  ;;  %320 = vmatprep.mubr.f32.mxu1 %v160_v41  ;;  %v112_v63 = vld [vmem:[%s1209_s1 + $0x310] sm:$0xff]  ;;  %v113_v1 = vld [vmem:[%s1209_s1 + $0x318] sm:$0xff]  ;;  %v130_v4 = vld [vmem:[%s1209_s1 + $0x3a0] sm:$0xff]  ;;  %v692_v6 = vpack.c.bf16 %v81_v62, %v80_v61  ;;  %v694_v8 = vpack.c.bf16 %v99_v3, %v98_v2 }
  0x1d   :  { %v131_v5 = vld [vmem:[%s1209_s1 + $0x3a8] sm:$0xff]  ;;  %v724_v7 = vpack.c.bf16 %v113_v1, %v112_v63  ;;  %v82_v9 = vld [vmem:[%s1209_s1 + $0x220] sm:$0xff]  ;;  %v100_v15 = vld [vmem:[%s1209_s1 + $0x2b0] sm:$0xff] }
  0x1e   :  { %649 = vmatpush3.bf16.msra.mxu0 %v648_v31  ;;  %v83_v10 = vld [vmem:[%s1209_s1 + $0x228] sm:$0xff]  ;;  %v114_v11 = vld [vmem:[%s1209_s1 + $0x320] sm:$0xff]  ;;  %v726_v12 = vpack.c.bf16 %v131_v5, %v130_v4  ;;  %v101_v16 = vld [vmem:[%s1209_s1 + $0x2b8] sm:$0xff] }
  0x1f   :  { %681 = vmatpush3.bf16.msra.mxu1 %v680_v34  ;;  %651 = vmatprep.subr.bf16.mxu0 %v650_v35  ;;  %v115_v14 = vld [vmem:[%s1209_s1 + $0x328] sm:$0xff]  ;;  %v132_v17 = vld [vmem:[%s1209_s1 + $0x3b0] sm:$0xff]  ;;  %v133_v18 = vld [vmem:[%s1209_s1 + $0x3b8] sm:$0xff]  ;;  %v696_v19 = vpack.c.bf16 %v83_v10, %v82_v9  ;;  %v698_v22 = vpack.c.bf16 %v101_v16, %v100_v15 }
  0x20   :  { %683 = vmatprep.subr.bf16.mxu1 %v682_v39  ;;  %v84_v20 = vld [vmem:[%s1209_s1 + $0x230] sm:$0xff]  ;;  %v728_v21 = vpack.c.bf16 %v115_v14, %v114_v11  ;;  %v85_v23 = vld [vmem:[%s1209_s1 + $0x238] sm:$0xff]  ;;  %v730_v26 = vpack.c.bf16 %v133_v18, %v132_v17  ;;  %v103_v28 = vld [vmem:[%s1209_s1 + $0x2c8] sm:$0xff] }
  0x21   :  { %v116_v24 = vld [vmem:[%s1209_s1 + $0x330] sm:$0xff]  ;;  %v117_v25 = vld [vmem:[%s1209_s1 + $0x338] sm:$0xff]  ;;  %v134_v29 = vld [vmem:[%s1209_s1 + $0x3c0] sm:$0xff] }
  0x22   :  { %653 = vmatpush3.bf16.msra.mxu0 %v652_v46  ;;  %v135_v30 = vld [vmem:[%s1209_s1 + $0x3c8] sm:$0xff] }
  0x23   :  { %685 = vmatpush3.bf16.msra.mxu1 %v684_v47  ;;  %687 = vmatprep.subr.bf16.mxu0 %v686_v48  ;;  %v13_v31 = vld [vmem:[%s1208_s0 + $0x8] sm:$0xff] }
  0x24   :  { %719 = vmatprep.subr.bf16.mxu1 %v718_v52 }
  0x25   :  { %251 = vmatmul.mubr.f32.vlgmr.msra.gmra.mrb[0].mxu0 %v151_v27  ;;  %v102_v27 = vld [vmem:[%s1209_s1 + $0x2c0] sm:$0xff] }
  0x26   :  { %321 = vmatmul.mubr.f32.vlgmr.msra.gmra.mrb[0].mxu1 %v158_v33  ;;  %689 = vmatpush3.bf16.msra.mxu0 %v688_v58 }
  0x27   :  { %721 = vmatpush3.bf16.msra.mxu1 %v720_v59  ;;  %691 = vmatprep.subr.bf16.mxu0 %v690_v60 }
  0x28   :  { %723 = vmatprep.subr.bf16.mxu1 %v722_v0 }
  0x2a   :  { %693 = vmatpush3.bf16.msra.mxu0 %v692_v6 }
  0x2b   :  { %725 = vmatpush3.bf16.msra.mxu1 %v724_v7  ;;  %695 = vmatprep.subr.bf16.mxu0 %v694_v8 }
  0x2c   :  { %727 = vmatprep.subr.bf16.mxu1 %v726_v12 }
  0x2d   :  { %7 = vsyncpa [#allocation3], 0  ;;  %v700_v32 = vpack.c.bf16 %v85_v23, %v84_v20  ;;  %v1106_v33 = vrot.slane %v13_v31, %v945_v13  ;;  %v161_v34 = vcombine.high %v13_v31, %v13_v31  ;;  %v732_v35 = vpack.c.bf16 %v117_v25, %v116_v24  ;;  %v86_v37 = vld [vmem:[%s1209_s1 + $0x240] sm:$0xff]  ;;  %v87_v38 = vld [vmem:[%s1209_s1 + $0x248] sm:$0xff] }
  0x2e   :  { %697 = vmatpush3.bf16.msra.mxu0 %v696_v19  ;;  %v702_v36 = vpack.c.bf16 %v103_v28, %v102_v27  ;;  %v118_v39 = vld [vmem:[%s1209_s1 + $0x340] sm:$0xff]  ;;  %v734_v40 = vpack.c.bf16 %v135_v30, %v134_v29  ;;  %v119_v41 = vld [vmem:[%s1209_s1 + $0x348] sm:$0xff]  ;;  %v104_v42 = vld [vmem:[%s1209_s1 + $0x2d0] sm:$0xff]  ;;  %v704_v48 = vpack.c.bf16 %v87_v38, %v86_v37  ;;  %vm466_vm0 = vcmask 254976  }
  0x2f   :  { %729 = vmatpush3.bf16.msra.mxu1 %v728_v21  ;;  %699 = vmatprep.subr.bf16.mxu0 %v698_v22  ;;  %v105_v43 = vld [vmem:[%s1209_s1 + $0x2d8] sm:$0xff]  ;;  %v176_v44 = vcombine.high %v1106_v33, %v1106_v33  ;;  %v175_v45 = vrot.slane %v161_v34, %v945_v13  ;;  %v136_v46 = vld [vmem:[%s1209_s1 + $0x3d0] sm:$0xff]  ;;  %v736_v50 = vpack.c.bf16 %v119_v41, %v118_v39  ;;  %v106_v56 = vld [vmem:[%s1209_s1 + $0x2e0] sm:$0xff] }
  0x30   :  { %731 = vmatprep.subr.bf16.mxu1 %v730_v26  ;;  %v137_v47 = vld [vmem:[%s1209_s1 + $0x3d8] sm:$0xff]  ;;  %v706_v51 = vpack.c.bf16 %v105_v43, %v104_v42  ;;  %v88_v13 = vld [vmem:[%s1209_s1 + $0x250] sm:$0xff]  ;;  %v107_v57 = vld [vmem:[%s1209_s1 + $0x2e8] sm:$0xff] }
  0x31   :  { %390 = vmatprep.mubr.f32.mxu0 %v176_v44  ;;  %v177_v49 = vcombine.high %v175_v45, %v175_v45  ;;  %v89_v52 = vld [vmem:[%s1209_s1 + $0x258] sm:$0xff]  ;;  %v120_v53 = vld [vmem:[%s1209_s1 + $0x350] sm:$0xff]  ;;  %v738_v54 = vpack.c.bf16 %v137_v47, %v136_v46  ;;  %v138_v58 = vld [vmem:[%s1209_s1 + $0x3e0] sm:$0xff]  ;;  %v710_v62 = vpack.c.bf16 %v107_v57, %v106_v56 }
  0x32   :  { %701 = vmatpush3.bf16.msra.mxu0 %v700_v32  ;;  %v121_v55 = vld [vmem:[%s1209_s1 + $0x358] sm:$0xff]  ;;  %v139_v59 = vld [vmem:[%s1209_s1 + $0x3e8] sm:$0xff]  ;;  %v708_v60 = vpack.c.bf16 %v89_v52, %v88_v13  ;;  %v90_v63 = vld [vmem:[%s1209_s1 + $0x260] sm:$0xff] }
  0x33   :  { %733 = vmatpush3.bf16.msra.mxu1 %v732_v35  ;;  %703 = vmatprep.subr.bf16.mxu0 %v702_v36  ;;  %v740_v61 = vpack.c.bf16 %v121_v55, %v120_v53  ;;  %v91_v0 = vld [vmem:[%s1209_s1 + $0x268] sm:$0xff]  ;;  %v122_v1 = vld [vmem:[%s1209_s1 + $0x360] sm:$0xff]  ;;  %v742_v2 = vpack.c.bf16 %v139_v59, %v138_v58  ;;  %v108_v4 = vld [vmem:[%s1209_s1 + $0x2f0] sm:$0xff] }
  0x34   :  { %735 = vmatprep.subr.bf16.mxu1 %v734_v40  ;;  %460 = vmatprep.mubr.f32.mxu1 %v177_v49  ;;  %v123_v3 = vld [vmem:[%s1209_s1 + $0x368] sm:$0xff]  ;;  %v109_v5 = vld [vmem:[%s1209_s1 + $0x2f8] sm:$0xff]  ;;  %v140_v6 = vld [vmem:[%s1209_s1 + $0x3f0] sm:$0xff]  ;;  %v712_v8 = vpack.c.bf16 %v91_v0, %v90_v63 }
  0x35   :  { %v141_v7 = vld [vmem:[%s1209_s1 + $0x3f8] sm:$0xff]  ;;  %v744_v9 = vpack.c.bf16 %v123_v3, %v122_v1  ;;  %v714_v10 = vpack.c.bf16 %v109_v5, %v108_v4  ;;  %v92_v11 = vld [vmem:[%s1209_s1 + $0x270] sm:$0xff] }
  0x36   :  { %705 = vmatpush3.bf16.msra.mxu0 %v704_v48  ;;  %v93_v12 = vld [vmem:[%s1209_s1 + $0x278] sm:$0xff]  ;;  %v746_v14 = vpack.c.bf16 %v141_v7, %v140_v6  ;;  %v124_v15 = vld [vmem:[%s1209_s1 + $0x370] sm:$0xff] }
  0x37   :  { %737 = vmatpush3.bf16.msra.mxu1 %v736_v50  ;;  %707 = vmatprep.subr.bf16.mxu0 %v706_v51  ;;  %v125_v16 = vld [vmem:[%s1209_s1 + $0x378] sm:$0xff]  ;;  %v716_v17 = vpack.c.bf16 %v93_v12, %v92_v11  ;;  %s779_s1 = smov [#allocation2]  }
  0x38   :  { %739 = vmatprep.subr.bf16.mxu1 %v738_v54  ;;  %v748_v18 = vpack.c.bf16 %v125_v16, %v124_v15  ;;  %s474_s15 = sshll.u32 %s779_s1, 4  ;;  %s475_s15 = int_to_ptr.vmem [resolvable:$true] %s474_s15 }
  0x39   :  { %s754_s16 = scalar_lea.vmem %s475_s15, 32  ;;  %p759_p1 = scmp.lt.s32.totalorder %s475_s15, %s475_s15 }
  0x3a   :  { %709 = vmatpush3.bf16.msra.mxu0 %v708_v60  ;;  %p755_p0 = scmp.ne.s32.totalorder %s475_s15, %s754_s16  ;;  %p760_p2 = scmp.lt.s32.totalorder %s754_s16, %s754_s16 }
  0x3b   :  { %741 = vmatpush3.bf16.msra.mxu1 %v740_v61  ;;  %711 = vmatprep.subr.bf16.mxu0 %v710_v62 }
  0x3c   :  { %743 = vmatprep.subr.bf16.mxu1 %v742_v2  ;;  %p761_p3 = por %p760_p2, %p759_p1 }
  0x3e   :  { %713 = vmatpush3.bf16.msra.mxu0 %v712_v8  ;;  %p762_p4 = pnand %p761_p3, %p755_p0 }
  0x3f   :  { %745 = vmatpush3.bf16.msra.mxu1 %v744_v9  ;;  %715 = vmatprep.subr.bf16.mxu0 %v714_v10 }
  0x40   :  { %747 = vmatprep.subr.bf16.mxu1 %v746_v14 }
  0x42   :  { %717 = vmatpush3.bf16.msra.mxu0 %v716_v17 }
  0x43   :  { %749 = vmatpush3.bf16.msra.mxu1 %v748_v18 }
  0x45   :  { %391 = vmatmul.mubr.f32.vlgmr.msra.gmra.mrb[2].mxu0 %v1106_v33 }
  0x46   :  { %461 = vmatmul.mubr.f32.vlgmr.msra.gmra.mrb[2].mxu1 %v175_v45 }
  0xf8   :  { %v514_v19 = vpop.f32.mrb[0].mxu0 }
  0xf9   :  { %v549_v20 = vpop.f32.mrb[0].mxu1  ;;  %v515_v21 = vpop.f32.mrb[1].mxu0 }
  0xfa   :  { %v516_v22 = vadd.f32 %v515_v21, %v514_v19  ;;  %v550_v23 = vpop.f32.mrb[1].mxu1 }
  0xfb   :  { %v551_v24 = vadd.f32 %v550_v23, %v549_v20 }
  0xfd   :  { %v323_v25 = vadd.f32 %v551_v24, %v516_v22 }
 0x118   :  { %v584_v26 = vpop.f32.mrb[2].mxu0 }
 0x119   :  { %v585_v27 = vpop.f32.mrb[3].mxu0  ;;  %v619_v28 = vpop.f32.mrb[2].mxu1 }
 0x11a   :  { %v586_v29 = vadd.f32 %v585_v27, %v584_v26  ;;  %v620_v30 = vpop.f32.mrb[3].mxu1 }
 0x11b   :  { %v621_v31 = vadd.f32 %v620_v30, %v619_v28 }
 0x11c   :  { %v393_v32 = vadd.f32 %v586_v29, %v323_v25 }
 0x11e   :  { %v463_v34 = vadd.f32 %v621_v31, %v393_v32 }
 0x120   :  { %467 = vst.msk [vmem:[#allocation2] sm:$0x3] %vm466_vm0, %v463_v34 }
 0x121   :  { %765 = shalt.err (!%p762_p4)
}
 0x122   :  { %s766_s19 = scalar_lea.hbm %s1210_s2, 32 }
 0x123   :  { %p767_p5 = scmp.ne.s32.totalorder %s1210_s2, %s766_s19  ;;  %p770_p6 = scmp.lt.u32.totalorder %s766_s19, %s1210_s2 }
 0x125   :  { %p772_p7 = pnand %p770_p6, %p767_p5 }
 0x127   :  { %775 = shalt.err (!%p772_p7)
}
 0x128   :  { %477 = dma.vmem_to_hbm [thread:$0]  %s475_s15, 32, %s1210_s2, [#allocation3]  }
 0x129   :  { %776 = dma.done.wait [#allocation3], 32  }
 0x12a   :  { %777 = vsyncadd [#allocation3], 4294967264 }
 0x12b   :  { %481 = vsyncpa [#allocation3], 1 }

</bundles_post_ra>
